<compile_context>
chip_gen: v5e
topology: v5e:2x2
jax: 0.10.0
libtpu: 0.0.40
codegen_flags: <defaults>
</compile_context>

<pallas_src>
import math

import jax
import jax.numpy as jnp
from jax.experimental import pallas as pl
from jax.experimental.pallas import tpu as pltpu


def _round_up(x, m):
    return ((x + m - 1) // m) * m


# ---------------------------------------------------------------------------
# Kernels
# ---------------------------------------------------------------------------
def gcn_fused_kernel(adj_ref, x_ref, w_ref, out_ref, acc_ref):
    """acc += adj_tile @ x_tile ; on last k: out = acc @ W.

    adj_ref: (tm, tk)      x_ref: (tk, F_in)   w_ref: (F_in, F_out_pad)
    out_ref: (tm, F_out_pad)                   acc_ref: (tm, F_in) f32
    """
    # TODO(synk): training-mode dropout would use pltpu.prng_seed /
    # pltpu.stateful_bernoulli on x here; eval mode (training=False) is identity.
    k = pl.program_id(1)

    @pl.when(k == 0)
    def _():
        acc_ref[...] = jnp.zeros_like(acc_ref)

    acc_ref[...] += jnp.dot(
        adj_ref[...], x_ref[...], preferred_element_type=jnp.float32
    )

    @pl.when(k == pl.num_programs(1) - 1)
    def _():
        out_ref[...] = jnp.dot(
            acc_ref[...], w_ref[...], preferred_element_type=jnp.float32
        ).astype(out_ref.dtype)


def gcn_pre_kernel(adj_ref, xw_ref, out_ref, acc_ref):
    """acc += adj_tile @ xw_tile ; on last k: out = acc.  (xw = x @ W precomputed)

    adj_ref: (tm, tk)   xw_ref: (tk, F_out_pad)
    out_ref: (tm, F_out_pad)   acc_ref: (tm, F_out_pad) f32
    """
    k = pl.program_id(1)

    @pl.when(k == 0)
    def _():
        acc_ref[...] = jnp.zeros_like(acc_ref)

    acc_ref[...] += jnp.dot(
        adj_ref[...], xw_ref[...], preferred_element_type=jnp.float32
    )

    @pl.when(k == pl.num_programs(1) - 1)
    def _():
        out_ref[...] = acc_ref[...].astype(out_ref.dtype)


# ---------------------------------------------------------------------------
# Wrapper
# ---------------------------------------------------------------------------
def graph_convolution_layer(
    x, adj, weight, *, tm=256, tk=512, compute_dtype=jnp.float32
):
    """out = adj @ x @ weight  (dropout is identity in eval mode)."""
    n, f_in = x.shape
    f_in_w, f_out = weight.shape
    assert f_in_w == f_in
    assert adj.shape == (n, n)
    assert tm % 128 == 0 and tk % 128 == 0, "tiles must be multiples of 128"

    out_dtype = x.dtype
    itm = jnp.dtype(compute_dtype).itemsize

    # Lane-dense output padding.
    f_out_pad = _round_up(f_out, 128)

    # Clamp tiles to the (padded) problem, keep them 128-aligned.
    n_min = _round_up(n, 128)
    tm = min(tm, n_min)
    tk = min(tk, n_min)

    # Pad row / contraction dims of adj independently to the tile grid.
    n_m = _round_up(n, tm)
    n_k = _round_up(n, tk)
    grid = (n_m // tm, n_k // tk)

    adj_p = adj
    if (n_m, n_k) != (n, n):
        adj_p = jnp.pad(adj, ((0, n_m - n), (0, n_k - n)))
    adj_p = adj_p.astype(compute_dtype)

    # Shape-dependent ordering: reduce the N^2-scaled matmul to the smaller
    # feature dimension.
    reorder = f_in >= f_out

    if reorder:
        # xw = x @ W once (tiny), kernel streams adj @ xw.
        xw = jnp.dot(x, weight, preferred_element_type=jnp.float32)
        xw = jnp.pad(xw, ((0, n_k - n), (0, f_out_pad - f_out)))
        rhs = xw.astype(compute_dtype)
        f_rhs = f_out_pad
        f_acc = f_out_pad
        flops = 2 * n_m * n_k * f_out_pad
        bytes_accessed = (
            itm * (n_m * n_k + grid[0] * n_k * f_rhs) + 4 * n_m * f_out_pad
        )
    else:
        x_p = x if n_k == n else jnp.pad(x, ((0, n_k - n), (0, 0)))
        rhs = x_p.astype(compute_dtype)
        f_rhs = f_in
        f_acc = f_in
        w_p = weight
        if f_out_pad != f_out:
            w_p = jnp.pad(weight, ((0, 0), (0, f_out_pad - f_out)))
        w_p = w_p.astype(jnp.float32)
        flops = 2 * n_m * n_k * f_in + 2 * n_m * f_in * f_out_pad
        bytes_accessed = (
            itm * (n_m * n_k + grid[0] * n_k * f_in)
            + 4 * (f_in * f_out_pad + n_m * f_out_pad)
        )

    # Explicit VMEM budget (double-buffered inputs/outputs + accumulator),
    # capped well below v7x's 64 MiB per TensorCore.
    vmem_bytes = (
        2 * tm * tk * itm              # adj tiles
        + 2 * tk * f_rhs * itm         # rhs tiles
        + 2 * tm * f_out_pad * 4       # output tiles
        + tm * f_acc * 4               # accumulator scratch
        + (0 if reorder else 2 * f_in * f_out_pad * 4)  # resident W
    )
    vmem_limit = min(int(vmem_bytes * 1.5) + (4 << 20), 48 << 20)

    compiler_params = pltpu.CompilerParams(
        dimension_semantics=("parallel", "arbitrary"),
        vmem_limit_bytes=vmem_limit,
    )
    cost = pl.CostEstimate(
        flops=flops, bytes_accessed=bytes_accessed, transcendentals=0
    )

    if reorder:
        out = pl.pallas_call(
            gcn_pre_kernel,
            out_shape=jax.ShapeDtypeStruct((n_m, f_out_pad), out_dtype),
            grid_spec=pltpu.PrefetchScalarGridSpec(
                num_scalar_prefetch=0,
                grid=grid,
                in_specs=[
                    pl.BlockSpec((tm, tk), lambda i, k: (i, k)),
                    pl.BlockSpec((tk, f_out_pad), lambda i, k: (k, 0)),
                ],
                out_specs=pl.BlockSpec((tm, f_out_pad), lambda i, k: (i, 0)),
                scratch_shapes=[pltpu.VMEM((tm, f_out_pad), jnp.float32)],
            ),
            compiler_params=compiler_params,
            cost_estimate=cost,
        )(adj_p, rhs)
    else:
        out = pl.pallas_call(
            gcn_fused_kernel,
            out_shape=jax.ShapeDtypeStruct((n_m, f_out_pad), out_dtype),
            grid_spec=pltpu.PrefetchScalarGridSpec(
                num_scalar_prefetch=0,
                grid=grid,
                in_specs=[
                    pl.BlockSpec((tm, tk), lambda i, k: (i, k)),
                    pl.BlockSpec((tk, f_in), lambda i, k: (k, 0)),
                    pl.BlockSpec((f_in, f_out_pad), lambda i, k: (0, 0)),
                ],
                out_specs=pl.BlockSpec((tm, f_out_pad), lambda i, k: (i, 0)),
                scratch_shapes=[pltpu.VMEM((tm, f_in), jnp.float32)],
            ),
            compiler_params=compiler_params,
            cost_estimate=cost,
        )(adj_p, rhs, w_p)

    return out[:n, :f_out]


def xavier_uniform_relu(key, fan_in, fan_out, dtype=jnp.float32):
    # torch.nn.init.xavier_uniform_ with gain = calculate_gain('relu') = sqrt(2)
    gain = math.sqrt(2.0)
    bound = gain * math.sqrt(6.0 / (fan_in + fan_out))
    return jax.random.uniform(
        key, (fan_in, fan_out), dtype=dtype, minval=-bound, maxval=bound
    )


if __name__ == "__main__":
    key = jax.random.PRNGKey(0)
    k_x, k_adj, k_w, k_x2, k_w2 = jax.random.split(key, 5)

    N = 200          # deliberately not a multiple of 128 (exercises padding)
    F_IN = 32        # in_features
    F_OUT = 64       # out_features
    DROPOUT = 0.5    # identity in eval mode

    x = jax.random.normal(k_x, (N, F_IN), dtype=jnp.float32)

    # Deterministic dense "normalized adjacency": random sparse-ish matrix,
    # symmetrized, self-loops, row-normalized.
    a = (jax.random.uniform(k_adj, (N, N)) < 0.1).astype(jnp.float32)
    a = jnp.maximum(a, a.T) + jnp.eye(N, dtype=jnp.float32)
    adj = a / jnp.sum(a, axis=1, keepdims=True)

    weight = xavier_uniform_relu(k_w, F_IN, F_OUT)
    ref = adj @ x @ weight

    # 1) f32 fused path (F_in < F_out): K-tiled (adj@x)@W kernel.
    out = graph_convolution_layer(x, adj, weight, tm=128, tk=128)
    out = jax.block_until_ready(out)
    assert out.shape == (N, F_OUT)
    assert jnp.allclose(out, ref, atol=1e-3, rtol=1e-3), "f32 mismatch"

    # 2) bf16 streaming of the HBM-bound operands, f32 accumulation/output.
    out_bf16 = graph_convolution_layer(
        x, adj, weight, tm=128, tk=128, compute_dtype=jnp.bfloat16
    )
    out_bf16 = jax.block_until_ready(out_bf16)
    assert jnp.allclose(out_bf16, ref, atol=5e-2, rtol=5e-2), "bf16 mismatch"

    # 3) reordered path (F_in >= F_out): xw = x@W precomputed, kernel = adj@xw.
    x2 = jax.random.normal(k_x2, (N, 96), dtype=jnp.float32)
    w2 = xavier_uniform_relu(k_w2, 96, 32)
    out2 = graph_convolution_layer(x2, adj, w2, tm=128, tk=128)
    out2 = jax.block_until_ready(out2)
    ref2 = adj @ x2 @ w2
    assert out2.shape == (N, 32)
    assert jnp.allclose(out2, ref2, atol=1e-3, rtol=1e-3), "reorder mismatch"

    print("KERNEL_OK")
</pallas_src>

<mosaic_0001>
module attributes {stable_mosaic.version = 11 : i64} {
  func.func @gcn_fused_kernel(%arg0: i32, %arg1: i32, %arg2: memref<128x128xf32, #tpu.memory_space<vmem>>, %arg3: memref<128x32xf32, #tpu.memory_space<vmem>>, %arg4: memref<32x128xf32, #tpu.memory_space<vmem>>, %arg5: memref<128x128xf32, #tpu.memory_space<vmem>>, %arg6: memref<128x32xf32, #tpu.memory_space<vmem>>) attributes {dimension_semantics = [#tpu.dimension_semantics<parallel>, #tpu.dimension_semantics<arbitrary>], iteration_bounds = array<i64: 2, 2>, scalar_prefetch = 0 : i64, scratch_operands = 1 : i64, tpu.core_type = #tpu.core_type<tc>, window_params = [{transform_indices = @transform_0, window_bounds = array<i64: 128, 128>}, {transform_indices = @transform_1, window_bounds = array<i64: 128, 32>}, {pipeline_mode = #tpu.pipeline_mode<synchronous>, transform_indices = @transform_2, window_bounds = array<i64: 32, 128>}, {transform_indices = @transform_3, window_bounds = array<i64: 128, 128>}]} {
    %c0_i32 = arith.constant 0 : i32
    %0 = arith.cmpi eq, %arg1, %c0_i32 : i32
    %1 = arith.extui %0 : i1 to i32
    %c0_i32_0 = arith.constant 0 : i32
    %2 = arith.cmpi ne, %1, %c0_i32_0 : i32
    scf.if %2 {
      %cst_9 = arith.constant 0.000000e+00 : f32
      %12 = vector.broadcast %cst_9 : f32 to vector<128x32xf32>
      %c0_10 = arith.constant 0 : index
      %c0_11 = arith.constant 0 : index
      %13 = vector.load %arg6[%c0_10, %c0_11] : memref<128x32xf32, #tpu.memory_space<vmem>>, vector<128x32xf32>
      tpu.vector_store %arg6[%c0_10, %c0_11], %12 {strides = array<i32>} : memref<128x32xf32, #tpu.memory_space<vmem>>, vector<128x32xf32>,
    } else {
    }
    %c0 = arith.constant 0 : index
    %c0_1 = arith.constant 0 : index
    %3 = vector.load %arg6[%c0, %c0_1] : memref<128x32xf32, #tpu.memory_space<vmem>>, vector<128x32xf32>
    %c0_2 = arith.constant 0 : index
    %c0_3 = arith.constant 0 : index
    %4 = vector.load %arg2[%c0_2, %c0_3] : memref<128x128xf32, #tpu.memory_space<vmem>>, vector<128x128xf32>
    %c0_4 = arith.constant 0 : index
    %c0_5 = arith.constant 0 : index
    %5 = vector.load %arg3[%c0_4, %c0_5] : memref<128x32xf32, #tpu.memory_space<vmem>>, vector<128x32xf32>
    %cst = arith.constant dense<0.000000e+00> : vector<128x32xf32>
    %6 = tpu.matmul %4, %5, %cst {dimension_numbers = #tpu.dot_dimension_numbers<[1], [0], [0], [1], [0, 0, 1, 1], [], []>} : vector<128x128xf32>, vector<128x32xf32>, vector<128x32xf32> -> vector<128x32xf32>
    %7 = arith.addf %3, %6 : vector<128x32xf32>
    %c0_6 = arith.constant 0 : index
    %c0_7 = arith.constant 0 : index
    %8 = vector.load %arg6[%c0_6, %c0_7] : memref<128x32xf32, #tpu.memory_space<vmem>>, vector<128x32xf32>
    tpu.vector_store %arg6[%c0_6, %c0_7], %7 {strides = array<i32>} : memref<128x32xf32, #tpu.memory_space<vmem>>, vector<128x32xf32>,
    %c1_i32 = arith.constant 1 : i32
    %9 = arith.cmpi eq, %arg1, %c1_i32 : i32
    %10 = arith.extui %9 : i1 to i32
    %c0_i32_8 = arith.constant 0 : i32
    %11 = arith.cmpi ne, %10, %c0_i32_8 : i32
    scf.if %11 {
      %c0_9 = arith.constant 0 : index
      %c0_10 = arith.constant 0 : index
      %12 = vector.load %arg6[%c0_9, %c0_10] : memref<128x32xf32, #tpu.memory_space<vmem>>, vector<128x32xf32>
      %c0_11 = arith.constant 0 : index
      %c0_12 = arith.constant 0 : index
      %13 = vector.load %arg4[%c0_11, %c0_12] : memref<32x128xf32, #tpu.memory_space<vmem>>, vector<32x128xf32>
      %cst_13 = arith.constant dense<0.000000e+00> : vector<128x128xf32>
      %14 = tpu.matmul %12, %13, %cst_13 {dimension_numbers = #tpu.dot_dimension_numbers<[1], [0], [0], [1], [0, 0, 1, 1], [], []>} : vector<128x32xf32>, vector<32x128xf32>, vector<128x128xf32> -> vector<128x128xf32>
      %c0_14 = arith.constant 0 : index
      %c0_15 = arith.constant 0 : index
      %15 = vector.load %arg5[%c0_14, %c0_15] : memref<128x128xf32, #tpu.memory_space<vmem>>, vector<128x128xf32>
      tpu.vector_store %arg5[%c0_14, %c0_15], %14 {strides = array<i32>} : memref<128x128xf32, #tpu.memory_space<vmem>>, vector<128x128xf32>,
    } else {
    }
    return
  }
  func.func @transform_0(%arg0: i32, %arg1: i32) -> (i32, i32) {
    %c0_i32 = arith.constant 0 : i32
    return %arg0, %arg1 : i32, i32
  }
  func.func @transform_1(%arg0: i32, %arg1: i32) -> (i32, i32) {
    %c0_i32 = arith.constant 0 : i32
    %c0_i32_0 = arith.constant 0 : i32
    return %arg1, %c0_i32 : i32, i32
  }
  func.func @transform_2(%arg0: i32, %arg1: i32) -> (i32, i32) {
    %c0_i32 = arith.constant 0 : i32
    %c0_i32_0 = arith.constant 0 : i32
    %c0_i32_1 = arith.constant 0 : i32
    return %c0_i32, %c0_i32_0 : i32, i32
  }
  func.func @transform_3(%arg0: i32, %arg1: i32) -> (i32, i32) {
    %c0_i32 = arith.constant 0 : i32
    %c0_i32_0 = arith.constant 0 : i32
    return %arg0, %c0_i32 : i32, i32
  }
}

</mosaic_0001>

<bundles_post_ra>
// kernel: tpu_custom_call.1
= control target key start
LH: loop header
LB: loop body
LE: loop exit
PB: predicated region body
PF: predicated region fallthrough
CT: control target
= control target key end

     0   :  { %8 = vsyncpa [#allocation4], 0  ;;  %s1342_s0 = inlined_call_operand.hbm [shape: f32[256,256], index: 0, kind: input, shape index: {}]   ;;  %s1343_s1 = inlined_call_operand.vmem [shape: f32[256,32], index: 1, kind: input, shape index: {}]   ;;  %s1344_s2 = inlined_call_operand.vmem [shape: f32[32,128], index: 2, kind: input, shape index: {}]   ;;  %s1345_s3 = inlined_call_operand.hbm [shape: f32[256,128], index: 3, kind: output, shape index: {}]  }
   0x1   :  { %10 = vsyncpa [#allocation4 + $0x1], 0 }
   0x2   :  { %11 = vsyncpa [#allocation5], 0 }
   0x3   :  { %13 = vsyncpa [#allocation5 + $0x1], 0  ;;  %s1051_s12 = smov 0   ;;  %s1053_s13 = smov 0  }
   0x4   :  { %s1055_s14 = smov 0   ;;  %s1057_s15 = smov 0  }
   0x5   :  { %s1059_s16 = smov 0   ;;  %s1061_s17 = smov 0  }
   0x6   :  { %s1063_s18 = smov 0   ;;  %s1065_s19 = smov 0  }
   0x7   :  { %s1067_s20 = smov 0   ;;  %s1069_s21 = smov 0  }
   0x8   :  { %s1071_s22 = smov 0  }
   0x9 LB: > { %1350 = sst [smem:[#allocation9_spill]] %s991_s14  ;;  %s665_s23 = sadd.s32 4294967295, %s1023_s22   ;;  %s1023_s22 = sphi %s1071_s22, %s19_s22   ;;  %s1019_s21 = sphi %s1069_s21, %s1373_s21   ;;  %s1015_s20 = sphi %s1067_s20, %s1372_s20   ;;  %s1011_s19 = sphi %s1065_s19, %s1371_s19   ;;  %s1007_s18 = sphi %s1063_s18, %s1370_s18   ;;  %s1003_s17 = sphi %s1061_s17, %s1363_s17   ;;  %s999_s16 = sphi %s1059_s16, %s1369_s16   ;;  %s995_s15 = sphi %s1057_s15, %s1368_s15   ;;  %s991_s14 = sphi %s1055_s14, %s1361_s14   ;;  %s987_s13 = sphi %s1053_s13, %s1367_s13   ;;  %s983_s12 = sphi %s1051_s12, %s1366_s12  }
   0xa   : > { %1351 = sst [smem:[#allocation10_spill]] %s1003_s17  ;;  %s666_s24 = sadd.s32 4294967294, %s1023_s22  }
   0xb   : > { %s28_s25 = sadd.s32 1, %s1015_s20  ;;  %s31_s26 = sadd.s32 1, %s1019_s21 }
   0xc   : > { %p29_p0 = scmp.ge.s32.totalorder %s28_s25, 2  ;;  %s40_s27 = sadd.s32 1, %s1003_s17 }
   0xd   : > { %p47_p1 = scmp.ne.s32.totalorder %s1003_s17, %s999_s16  ;;  %p48_p2 = scmp.eq.s32.totalorder %s1023_s22, 0 }
   0xe   : > { %s1375_s25 = smov (%p29_p0, %s28_s25), 0  ;;  %s1377_s26 = smov (!%p29_p0, %s31_s26), %s1019_s21 }
   0xf   : > { %1352 = sst [smem:[#allocation11_spill]] %s1375_s25  ;;  %s36_s28 = ssub.s32 %s1015_s20, %s1375_s25 }
  0x10   : > { %p1117_p3 = por %p48_p2, %p47_p1  ;;  %p33_p4 = scmp.ge.s32.totalorder %s1377_s26, 2 }
  0x11   : > { %p53_p5 = scmp.ne.s32.totalorder %s999_s16, %s995_s15  ;;  %p54_p6 = scmp.eq.s32.totalorder %s665_s23, 0 }
  0x12   : > { %s113_s30 = sadd.s32 1, %s991_s14  ;;  %s1379_s26 = smov (%p33_p4, %s1377_s26), 0 }
  0x13   : > { %1354 = sst [smem:[#allocation12_spill]] %s1379_s26  ;;  %p1125_p7 = por %p54_p6, %p53_p5 }
  0x14   : > { %p123_p8 = scmp.ne.s32.totalorder %s991_s14, %s987_s13  ;;  %s35_s5 = ssub.s32 %s1019_s21, %s1379_s26 }
  0x15   : > { %p124_p9 = scmp.eq.s32.totalorder %s665_s23, 3  ;;  %s37_s6 = sor.u32 %s36_s28, %s35_s5 }
  0x16   : > { %p111_p10 = scmp.eq.s32.totalorder %s35_s5, 0  ;;  %p38_p11 = scmp.eq.s32.totalorder %s37_s6, 0 }
  0x17   : > { %p1133_p12 = por %p124_p9, %p123_p8  ;;  %p129_p13 = scmp.ne.s32.totalorder %s987_s13, %s983_s12 }
  0x18   : > { %s1138_s8 = scalar_select %p111_p10, %s991_s14, %s113_s30  }
  0x19   : > { %s1141_s9 = scalar_select %p38_p11, %s1003_s17, %s40_s27  }
  0x1a   : > { %1357 = sst [smem:[#allocation13_spill]] %s1138_s8  ;;  %p130_p0 = scmp.eq.s32.totalorder %s666_s24, 3 }
  0x1b   : > { %1358 = sst [smem:[#allocation14_spill]] %s1141_s9  ;;  %p775_p1 = scmp.lt.s32.totalorder %s1023_s22, 4 }
  0x1c   : > { %p1146_p2 = por %p130_p0, %p129_p13  ;;  %s153_s11 = sand.u32 1, %s1003_s17  }
  0x1d   : > { %s669_s15 = sshll.u32 %s153_s11, 7  ;;  %s701_s23 = sshll.u32 %s1019_s21, 5 }
  0x1e   : > { %s162_s28 = sadd.s32 %s1015_s20, %s701_s23  ;;  %s157_s5 = scalar_lea.vmem [#allocation3], %s669_s15 }
  0x1f   : > { %s167_s6 = sshll.u32 %s157_s5, 4  ;;  %s672_s26 = sshll.u32 %s162_s28, 3  ;;  %s168_s6 = int_to_ptr.vmem [resolvable:$true] %s167_s6 }
  0x20   : > { %s164_s25 = scalar_lea.hbm %s1342_s0, %s672_s26  ;;  %p768_p4 = pnand %p775_p1, %p1117_p3 }
  0x21   : > { %s165_s24 = sshll.u32 %s164_s25, 4  ;;  %s154_s9 = scalar_lea.sflag [#allocation4], %s153_s11  ;;  %s166_s24 = int_to_ptr.hbm [resolvable:$true] %s165_s24 }
  0x22   : > { %s1025_s8 = smov 256   ;;  %s1026_s17 = smov 128  }
  0x23   : > { %s1027_s14 = smov 8   ;;  %p673_p5 = scmp.ge.s32.totalorder %s1023_s22, 1 }
  0x24   : > { %770 = dma.hbm_to_vmem [thread:$0]  (!%p768_p4), %s166_s24, 2048, %s168_s6, %s154_s9, %s1025_s8, %s1026_s17, %s1027_s14  }
  0x25   : > { %p184_p6 = scmp.lt.s32.totalorder %s1023_s22, 5 }
  0x27   : > { %p185_p8 = pnand %p673_p5, %p184_p6 }
  0x28   : > { %s190_s15 = sand.u32 (!%p185_p8), 1, %s999_s16  }
  0x29   : > { %188 = sbr.rel (%p185_p8) target bundleno = 447 (0x1bf), region = 32  ;;  %s674_s23 = sshll.u32 (!%p185_p8), %s190_s15, 7 }
  0x2a   : > { %s191_s28 = scalar_lea.sflag (!%p185_p8), [#allocation4], %s190_s15  ;;  %s1161_s5 = scalar_lea.vmem (!%p185_p8), [#allocation3], %s674_s23 }
  0x2e   : > { %974 = dma.done.wait (%p1125_p7), %s191_s28, 2048  }
  0x2f   : > { %976 = vsyncadd (%p1125_p7), %s191_s28, 4294965248  ;;  %s220_s14 = sand.u32 1, %s987_s13   ;;  %s676_s17 = sshll.u32 %s1007_s18, 4 }
  0x30   : > { %s675_s25 = sshll.u32 %s220_s14, 7  ;;  %p225_p3 = scmp.lt.s32.totalorder %s676_s17, 31 }
  0x31   : > { %s1176_s11 = scalar_lea.vmem [#allocation6], %s675_s25  ;;  %p678_p9 = scmp.ne.s32.totalorder %s1007_s18, 0 }
  0x32   : > { %s1381_s17 = smov (!%p225_p3, %s676_s17), 31 }
  0x33   : > { %s677_s26 = sshll.u32 %s1381_s17, 3  ;;  %234 = sbr.rel (%p678_p9) target bundleno = 73 (0x49), region = 40 }
  0x34   : > { %s1174_s9 = scalar_lea.vmem %s1343_s1, %s677_s26 }
  0x38   : > { %vm235_vm0 = vcmask 261120   ;;  %v1028_v0 = vmov 0.0  }
  0x39   : > { %236 = vst.msk [vmem:[#allocation2] sm:$0xff] %vm235_vm0, %v1028_v0 }
  0x3a   : > { %237 = vst.msk [vmem:[#allocation2 + $0x8] sm:$0xff] %vm235_vm0, %v1028_v0 }
  0x3b   : > { %238 = vst.msk [vmem:[#allocation2 + $0x10] sm:$0xff] %vm235_vm0, %v1028_v0 }
  0x3c   : > { %239 = vst.msk [vmem:[#allocation2 + $0x18] sm:$0xff] %vm235_vm0, %v1028_v0 }
  0x3d   : > { %240 = vst.msk [vmem:[#allocation2 + $0x20] sm:$0xff] %vm235_vm0, %v1028_v0 }
  0x3e   : > { %241 = vst.msk [vmem:[#allocation2 + $0x28] sm:$0xff] %vm235_vm0, %v1028_v0 }
  0x3f   : > { %242 = vst.msk [vmem:[#allocation2 + $0x30] sm:$0xff] %vm235_vm0, %v1028_v0 }
  0x40   : > { %243 = vst.msk [vmem:[#allocation2 + $0x38] sm:$0xff] %vm235_vm0, %v1028_v0 }
  0x41   : > { %244 = vst.msk [vmem:[#allocation2 + $0x40] sm:$0xff] %vm235_vm0, %v1028_v0 }
  0x42   : > { %245 = vst.msk [vmem:[#allocation2 + $0x48] sm:$0xff] %vm235_vm0, %v1028_v0 }
  0x43   : > { %246 = vst.msk [vmem:[#allocation2 + $0x50] sm:$0xff] %vm235_vm0, %v1028_v0 }
  0x44   : > { %247 = vst.msk [vmem:[#allocation2 + $0x58] sm:$0xff] %vm235_vm0, %v1028_v0 }
  0x45   : > { %248 = vst.msk [vmem:[#allocation2 + $0x60] sm:$0xff] %vm235_vm0, %v1028_v0 }
  0x46   : > { %249 = vst.msk [vmem:[#allocation2 + $0x68] sm:$0xff] %vm235_vm0, %v1028_v0 }
  0x47   : > { %250 = vst.msk [vmem:[#allocation2 + $0x70] sm:$0xff] %vm235_vm0, %v1028_v0 }
  0x48   : > { %251 = vst.msk [vmem:[#allocation2 + $0x78] sm:$0xff] %vm235_vm0, %v1028_v0 }
  0x49 PF: > { %v299_v1 = vld [vmem:[%s1174_s9 + $0x78] sm:$0xff]  ;;  %v298_v2 = vld [vmem:[%s1174_s9 + $0x70] sm:$0xff]  ;;  %v297_v3 = vld [vmem:[%s1174_s9 + $0x68] sm:$0xff]  ;;  %vm381_vm1 = vcmask 261120   ;;  %p679_p7 = scmp.ne.s32.totalorder %s1007_s18, 1 }
  0x4a   : > { %704 = vmatpush.msra.mxu2 %v299_v1  ;;  %705 = vmatpush.msra.mxu3 %v299_v1  ;;  %v296_v4 = vld [vmem:[%s1174_s9 + $0x60] sm:$0xff]  ;;  %v295_v5 = vld [vmem:[%s1174_s9 + $0x58] sm:$0xff]  ;;  %v294_v6 = vld [vmem:[%s1174_s9 + $0x50] sm:$0xff] }
  0x4b   : > { %300 = vmatpush.msra.mxu0 %v299_v1  ;;  %703 = vmatpush.msra.mxu1 %v299_v1  ;;  %v293_v7 = vld [vmem:[%s1174_s9 + $0x48] sm:$0xff]  ;;  %v292_v8 = vld [vmem:[%s1174_s9 + $0x40] sm:$0xff]  ;;  %v291_v9 = vld [vmem:[%s1174_s9 + $0x38] sm:$0xff] }
  0x4c   : > { %707 = vmatpush.msra.mxu2 %v298_v2  ;;  %708 = vmatpush.msra.mxu3 %v298_v2  ;;  %v290_v10 = vld [vmem:[%s1174_s9 + $0x30] sm:$0xff]  ;;  %v289_v11 = vld [vmem:[%s1174_s9 + $0x28] sm:$0xff]  ;;  %v288_v12 = vld [vmem:[%s1174_s9 + $0x20] sm:$0xff] }
  0x4d   : > { %301 = vmatpush.msra.mxu0 %v298_v2  ;;  %706 = vmatpush.msra.mxu1 %v298_v2  ;;  %v287_v13 = vld [vmem:[%s1174_s9 + $0x18] sm:$0xff]  ;;  %v286_v14 = vld [vmem:[%s1174_s9 + $0x10] sm:$0xff]  ;;  %v285_v15 = vld [vmem:[%s1174_s9 + $0x8] sm:$0xff] }
  0x4e   : > { %710 = vmatpush.msra.mxu2 %v297_v3  ;;  %711 = vmatpush.msra.mxu3 %v297_v3  ;;  %v284_v16 = vld [vmem:[%s1174_s9] sm:$0xff]  ;;  %v277_v21 = vld [vmem:[%s1161_s5 + $0x48] sm:$0xff]  ;;  %v278_v25 = vld [vmem:[%s1161_s5 + $0x50] sm:$0xff] }
  0x4f   : > { %302 = vmatpush.msra.mxu0 %v297_v3  ;;  %709 = vmatpush.msra.mxu1 %v297_v3  ;;  %v276_v17 = vld [vmem:[%s1161_s5 + $0x40] sm:$0xff]  ;;  %v281_v22 = vld [vmem:[%s1161_s5 + $0x68] sm:$0xff]  ;;  %v282_v26 = vld [vmem:[%s1161_s5 + $0x70] sm:$0xff] }
  0x50   : > { %713 = vmatpush.msra.mxu2 %v296_v4  ;;  %714 = vmatpush.msra.mxu3 %v296_v4  ;;  %v280_v18 = vld [vmem:[%s1161_s5 + $0x60] sm:$0xff]  ;;  %v269_v23 = vld [vmem:[%s1161_s5 + $0x8] sm:$0xff]  ;;  %v270_v27 = vld [vmem:[%s1161_s5 + $0x10] sm:$0xff] }
  0x51   : > { %303 = vmatpush.msra.mxu0 %v296_v4  ;;  %712 = vmatpush.msra.mxu1 %v296_v4  ;;  %v268_v19 = vld [vmem:[%s1161_s5] sm:$0xff]  ;;  %v273_v24 = vld [vmem:[%s1161_s5 + $0x28] sm:$0xff]  ;;  %v274_v28 = vld [vmem:[%s1161_s5 + $0x30] sm:$0xff] }
  0x52   : > { %716 = vmatpush.msra.mxu2 %v295_v5  ;;  %717 = vmatpush.msra.mxu3 %v295_v5  ;;  %v272_v20 = vld [vmem:[%s1161_s5 + $0x20] sm:$0xff]  ;;  %v279_v29 = vld [vmem:[%s1161_s5 + $0x58] sm:$0xff]  ;;  %v253_v45 = vld [vmem:[#allocation2 + $0x8] sm:$0xff] }
  0x53   : > { %304 = vmatpush.msra.mxu0 %v295_v5  ;;  %715 = vmatpush.msra.mxu1 %v295_v5  ;;  %v283_v30 = vld [vmem:[%s1161_s5 + $0x78] sm:$0xff]  ;;  %v252_v33 = vld [vmem:[#allocation2] sm:$0xff]  ;;  %v257_v46 = vld [vmem:[#allocation2 + $0x28] sm:$0xff] }
  0x54   : > { %719 = vmatpush.msra.mxu2 %v294_v6  ;;  %720 = vmatpush.msra.mxu3 %v294_v6  ;;  %v271_v31 = vld [vmem:[%s1161_s5 + $0x18] sm:$0xff]  ;;  %v256_v34 = vld [vmem:[#allocation2 + $0x20] sm:$0xff]  ;;  %v261_v51 = vld [vmem:[#allocation2 + $0x48] sm:$0xff] }
  0x55   : > { %305 = vmatpush.msra.mxu0 %v294_v6  ;;  %718 = vmatpush.msra.mxu1 %v294_v6  ;;  %v275_v32 = vld [vmem:[%s1161_s5 + $0x38] sm:$0xff]  ;;  %v260_v39 = vld [vmem:[#allocation2 + $0x40] sm:$0xff]  ;;  %v265_v52 = vld [vmem:[#allocation2 + $0x68] sm:$0xff] }
  0x56   : > { %722 = vmatpush.msra.mxu2 %v293_v7  ;;  %723 = vmatpush.msra.mxu3 %v293_v7  ;;  %v264_v40 = vld [vmem:[#allocation2 + $0x60] sm:$0xff]  ;;  %v254_v57 = vld [vmem:[#allocation2 + $0x10] sm:$0xff]  ;;  %v255_v5 = vld [vmem:[#allocation2 + $0x18] sm:$0xff] }
  0x57   : > { %306 = vmatpush.msra.mxu0 %v293_v7  ;;  %721 = vmatpush.msra.mxu1 %v293_v7  ;;  %v258_v58 = vld [vmem:[#allocation2 + $0x30] sm:$0xff]  ;;  %v259_v6 = vld [vmem:[#allocation2 + $0x38] sm:$0xff] }
  0x58   : > { %725 = vmatpush.msra.mxu2 %v292_v8  ;;  %726 = vmatpush.msra.mxu3 %v292_v8  ;;  %v262_v63 = vld [vmem:[#allocation2 + $0x50] sm:$0xff] }
  0x59   : > { %307 = vmatpush.msra.mxu0 %v292_v8  ;;  %724 = vmatpush.msra.mxu1 %v292_v8  ;;  %v266_v0 = vld [vmem:[#allocation2 + $0x70] sm:$0xff] }
  0x5a   : > { %728 = vmatpush.msra.mxu2 %v291_v9  ;;  %729 = vmatpush.msra.mxu3 %v291_v9 }
  0x5b   : > { %308 = vmatpush.msra.mxu0 %v291_v9  ;;  %727 = vmatpush.msra.mxu1 %v291_v9 }
  0x5c   : > { %731 = vmatpush.msra.mxu2 %v290_v10  ;;  %732 = vmatpush.msra.mxu3 %v290_v10 }
  0x5d   : > { %309 = vmatpush.msra.mxu0 %v290_v10  ;;  %730 = vmatpush.msra.mxu1 %v290_v10 }
  0x5e   : > { %734 = vmatpush.msra.mxu2 %v289_v11  ;;  %735 = vmatpush.msra.mxu3 %v289_v11 }
  0x5f   : > { %310 = vmatpush.msra.mxu0 %v289_v11  ;;  %733 = vmatpush.msra.mxu1 %v289_v11  ;;  %v263_v11 = vld [vmem:[#allocation2 + $0x58] sm:$0xff] }
  0x60   : > { %737 = vmatpush.msra.mxu2 %v288_v12  ;;  %738 = vmatpush.msra.mxu3 %v288_v12 }
  0x61   : > { %311 = vmatpush.msra.mxu0 %v288_v12  ;;  %736 = vmatpush.msra.mxu1 %v288_v12  ;;  %v267_v12 = vld [vmem:[#allocation2 + $0x78] sm:$0xff] }
  0x62   : > { %740 = vmatpush.msra.mxu2 %v287_v13  ;;  %741 = vmatpush.msra.mxu3 %v287_v13 }
  0x63   : > { %312 = vmatpush.msra.mxu0 %v287_v13  ;;  %739 = vmatpush.msra.mxu1 %v287_v13 }
  0x64   : > { %743 = vmatpush.msra.mxu2 %v286_v14  ;;  %744 = vmatpush.msra.mxu3 %v286_v14 }
  0x65   : > { %313 = vmatpush.msra.mxu0 %v286_v14  ;;  %742 = vmatpush.msra.mxu1 %v286_v14 }
  0x66   : > { %746 = vmatpush.msra.mxu2 %v285_v15  ;;  %747 = vmatpush.msra.mxu3 %v285_v15 }
  0x67   : > { %314 = vmatpush.msra.mxu0 %v285_v15  ;;  %745 = vmatpush.msra.mxu1 %v285_v15 }
  0x68   : > { %749 = vmatpush.msra.mxu2 %v284_v16  ;;  %750 = vmatpush.msra.mxu3 %v284_v16 }
  0x69   : > { %340 = vmatmul.f32.vlgmr.msra.gmra.mxu2 %v276_v17  ;;  %352 = vmatmul.f32.vlgmr.msra.gmra.mxu3 %v280_v18 }
  0x6a   : > { %315 = vmatpush.msra.mxu0 %v284_v16  ;;  %748 = vmatpush.msra.mxu1 %v284_v16 }
  0x6b   : > { %316 = vmatmul.f32.vlgmr.msra.gmra.mxu0 %v268_v19  ;;  %328 = vmatmul.f32.vlgmr.msra.gmra.mxu1 %v272_v20 }
  0x71   : > { %343 = vmatmul.f32.gmra.mxu2 %v277_v21  ;;  %355 = vmatmul.f32.gmra.mxu3 %v281_v22 }
  0x73   : > { %319 = vmatmul.f32.gmra.mxu0 %v269_v23  ;;  %331 = vmatmul.f32.gmra.mxu1 %v273_v24 }
  0x79   : > { %346 = vmatmul.f32.gmra.mxu2 %v278_v25  ;;  %358 = vmatmul.f32.gmra.mxu3 %v282_v26 }
  0x7b   : > { %322 = vmatmul.f32.gmra.mxu0 %v270_v27  ;;  %334 = vmatmul.f32.gmra.mxu1 %v274_v28 }
  0x81   : > { %349 = vmatmul.f32.gmra.mxu2 %v279_v29  ;;  %361 = vmatmul.f32.gmra.mxu3 %v283_v30 }
  0x83   : > { %325 = vmatmul.f32.gmra.mxu0 %v271_v31  ;;  %337 = vmatmul.f32.gmra.mxu1 %v275_v32 }
  0xe8   : > { %v317_v35 = vpop.f32.mrf.mxu0  ;;  %v329_v36 = vpop.f32.mrf.mxu1 }
  0xe9   : > { %v365_v37 = vadd.f32 %v317_v35, %v252_v33  ;;  %v369_v38 = vadd.f32 %v329_v36, %v256_v34 }
  0xeb   : > { %382 = vst.msk [vmem:[#allocation2] sm:$0xff] %vm381_vm1, %v365_v37 }
  0xec   : > { %386 = vst.msk [vmem:[#allocation2 + $0x20] sm:$0xff] %vm381_vm1, %v369_v38  ;;  %v341_v41 = vpop.f32.mrf.mxu2  ;;  %v353_v42 = vpop.f32.mrf.mxu3 }
  0xed   : > { %v373_v43 = vadd.f32 %v341_v41, %v260_v39  ;;  %v377_v44 = vadd.f32 %v353_v42, %v264_v40 }
  0xef   : > { %390 = vst.msk [vmem:[#allocation2 + $0x40] sm:$0xff] %vm381_vm1, %v373_v43 }
  0xf0   : > { %394 = vst.msk [vmem:[#allocation2 + $0x60] sm:$0xff] %vm381_vm1, %v377_v44  ;;  %v320_v47 = vpop.f32.mrf.mxu0  ;;  %v332_v48 = vpop.f32.mrf.mxu1 }
  0xf1   : > { %v366_v49 = vadd.f32 %v320_v47, %v253_v45  ;;  %v370_v50 = vadd.f32 %v332_v48, %v257_v46 }
  0xf3   : > { %383 = vst.msk [vmem:[#allocation2 + $0x8] sm:$0xff] %vm381_vm1, %v366_v49 }
  0xf4   : > { %387 = vst.msk [vmem:[#allocation2 + $0x28] sm:$0xff] %vm381_vm1, %v370_v50  ;;  %v344_v53 = vpop.f32.mrf.mxu2  ;;  %v356_v54 = vpop.f32.mrf.mxu3 }
  0xf5   : > { %v374_v55 = vadd.f32 %v344_v53, %v261_v51  ;;  %v378_v56 = vadd.f32 %v356_v54, %v265_v52 }
  0xf7   : > { %391 = vst.msk [vmem:[#allocation2 + $0x48] sm:$0xff] %vm381_vm1, %v374_v55 }
  0xf8   : > { %395 = vst.msk [vmem:[#allocation2 + $0x68] sm:$0xff] %vm381_vm1, %v378_v56  ;;  %v323_v59 = vpop.f32.mrf.mxu0  ;;  %v335_v60 = vpop.f32.mrf.mxu1 }
  0xf9   : > { %v367_v61 = vadd.f32 %v323_v59, %v254_v57  ;;  %v371_v62 = vadd.f32 %v335_v60, %v258_v58 }
  0xfb   : > { %384 = vst.msk [vmem:[#allocation2 + $0x10] sm:$0xff] %vm381_vm1, %v367_v61 }
  0xfc   : > { %388 = vst.msk [vmem:[#allocation2 + $0x30] sm:$0xff] %vm381_vm1, %v371_v62  ;;  %v347_v1 = vpop.f32.mrf.mxu2  ;;  %v359_v2 = vpop.f32.mrf.mxu3 }
  0xfd   : > { %v375_v3 = vadd.f32 %v347_v1, %v262_v63  ;;  %v379_v4 = vadd.f32 %v359_v2, %v266_v0 }
  0xff   : > { %392 = vst.msk [vmem:[#allocation2 + $0x50] sm:$0xff] %vm381_vm1, %v375_v3 }
 0x100   : > { %396 = vst.msk [vmem:[#allocation2 + $0x70] sm:$0xff] %vm381_vm1, %v379_v4  ;;  %v326_v7 = vpop.f32.mrf.mxu0  ;;  %v338_v8 = vpop.f32.mrf.mxu1 }
 0x101   : > { %v368_v9 = vadd.f32 %v326_v7, %v255_v5  ;;  %v372_v10 = vadd.f32 %v338_v8, %v259_v6 }
 0x103   : > { %385 = vst.msk [vmem:[#allocation2 + $0x18] sm:$0xff] %vm381_vm1, %v368_v9 }
 0x104   : > { %389 = vst.msk [vmem:[#allocation2 + $0x38] sm:$0xff] %vm381_vm1, %v372_v10  ;;  %v350_v13 = vpop.f32.mrf.mxu2  ;;  %v362_v14 = vpop.f32.mrf.mxu3  ;;  %401 = sbr.rel (%p679_p7) target bundleno = 431 (0x1af), region = 44 }
 0x105   : > { %v376_v15 = vadd.f32 %v350_v13, %v263_v11  ;;  %v380_v16 = vadd.f32 %v362_v14, %v267_v12 }
 0x107   : > { %393 = vst.msk [vmem:[#allocation2 + $0x58] sm:$0xff] %vm381_vm1, %v376_v15 }
 0x108   : > { %397 = vst.msk [vmem:[#allocation2 + $0x78] sm:$0xff] %vm381_vm1, %v380_v16 }
 0x109   : > { %v421_v17 = vld [vmem:[%s1344_s2 + $0x18] sm:$0xff]  ;;  %v420_v18 = vld [vmem:[%s1344_s2 + $0x10] sm:$0xff]  ;;  %v419_v19 = vld [vmem:[%s1344_s2 + $0x8] sm:$0xff] }
 0x10a   : > { %752 = vmatpush.msra.mxu2 %v421_v17  ;;  %753 = vmatpush.msra.mxu3 %v421_v17  ;;  %v418_v20 = vld [vmem:[%s1344_s2] sm:$0xff]  ;;  %v411_v25 = vld [vmem:[#allocation2 + $0x48] sm:$0xff]  ;;  %v412_v29 = vld [vmem:[#allocation2 + $0x50] sm:$0xff] }
 0x10b   : > { %482 = vmatpush.msra.mxu0 %v421_v17  ;;  %751 = vmatpush.msra.mxu1 %v421_v17  ;;  %v410_v21 = vld [vmem:[#allocation2 + $0x40] sm:$0xff]  ;;  %v415_v26 = vld [vmem:[#allocation2 + $0x68] sm:$0xff]  ;;  %v416_v30 = vld [vmem:[#allocation2 + $0x70] sm:$0xff] }
 0x10c   : > { %755 = vmatpush.msra.mxu2 %v420_v18  ;;  %756 = vmatpush.msra.mxu3 %v420_v18  ;;  %v414_v22 = vld [vmem:[#allocation2 + $0x60] sm:$0xff]  ;;  %v403_v27 = vld [vmem:[#allocation2 + $0x8] sm:$0xff]  ;;  %v404_v31 = vld [vmem:[#allocation2 + $0x10] sm:$0xff] }
 0x10d   : > { %483 = vmatpush.msra.mxu0 %v420_v18  ;;  %754 = vmatpush.msra.mxu1 %v420_v18  ;;  %v402_v23 = vld [vmem:[#allocation2] sm:$0xff]  ;;  %v407_v28 = vld [vmem:[#allocation2 + $0x28] sm:$0xff]  ;;  %v408_v32 = vld [vmem:[#allocation2 + $0x30] sm:$0xff] }
 0x10e   : > { %758 = vmatpush.msra.mxu2 %v419_v19  ;;  %759 = vmatpush.msra.mxu3 %v419_v19  ;;  %v406_v24 = vld [vmem:[#allocation2 + $0x20] sm:$0xff]  ;;  %v413_v33 = vld [vmem:[#allocation2 + $0x58] sm:$0xff] }
 0x10f   : > { %484 = vmatpush.msra.mxu0 %v419_v19  ;;  %757 = vmatpush.msra.mxu1 %v419_v19  ;;  %v417_v34 = vld [vmem:[#allocation2 + $0x78] sm:$0xff] }
 0x110   : > { %761 = vmatpush.msra.mxu2 %v418_v20  ;;  %762 = vmatpush.msra.mxu3 %v418_v20  ;;  %v405_v35 = vld [vmem:[#allocation2 + $0x18] sm:$0xff] }
 0x111   : > { %688 = vmatmul.msk.f32.vlgmr.msra.gmra.mxu2 %vm381_vm1, %v410_v21  ;;  %692 = vmatmul.msk.f32.vlgmr.msra.gmra.mxu3 %vm381_vm1, %v414_v22  ;;  %v409_v36 = vld [vmem:[#allocation2 + $0x38] sm:$0xff] }
 0x112   : > { %485 = vmatpush.msra.mxu0 %v418_v20  ;;  %760 = vmatpush.msra.mxu1 %v418_v20 }
 0x113   : > { %680 = vmatmul.msk.f32.vlgmr.msra.gmra.mxu0 %vm381_vm1, %v402_v23  ;;  %684 = vmatmul.msk.f32.vlgmr.msra.gmra.mxu1 %vm381_vm1, %v406_v24 }
 0x119   : > { %689 = vmatmul.msk.f32.gmra.mxu2 %vm381_vm1, %v411_v25  ;;  %693 = vmatmul.msk.f32.gmra.mxu3 %vm381_vm1, %v415_v26 }
 0x11b   : > { %681 = vmatmul.msk.f32.gmra.mxu0 %vm381_vm1, %v403_v27  ;;  %685 = vmatmul.msk.f32.gmra.mxu1 %vm381_vm1, %v407_v28 }
 0x121   : > { %690 = vmatmul.msk.f32.gmra.mxu2 %vm381_vm1, %v412_v29  ;;  %694 = vmatmul.msk.f32.gmra.mxu3 %vm381_vm1, %v416_v30 }
 0x123   : > { %682 = vmatmul.msk.f32.gmra.mxu0 %vm381_vm1, %v404_v31  ;;  %686 = vmatmul.msk.f32.gmra.mxu1 %vm381_vm1, %v408_v32 }
 0x129   : > { %691 = vmatmul.msk.f32.gmra.mxu2 %vm381_vm1, %v413_v33  ;;  %695 = vmatmul.msk.f32.gmra.mxu3 %vm381_vm1, %v417_v34 }
 0x12b   : > { %683 = vmatmul.msk.f32.gmra.mxu0 %vm381_vm1, %v405_v35  ;;  %687 = vmatmul.msk.f32.gmra.mxu1 %vm381_vm1, %v409_v36 }
 0x190   : > { %v487_v37 = vpop.f32.mrf.mxu0  ;;  %v499_v38 = vpop.f32.mrf.mxu1 }
 0x191   : > { %535 = vst [vmem:[%s1176_s11] sm:$0xff] %v487_v37 }
 0x192   : > { %539 = vst [vmem:[%s1176_s11 + $0x20] sm:$0xff] %v499_v38 }
 0x194   : > { %v511_v39 = vpop.f32.mrf.mxu2  ;;  %v523_v40 = vpop.f32.mrf.mxu3 }
 0x195   : > { %543 = vst [vmem:[%s1176_s11 + $0x40] sm:$0xff] %v511_v39 }
 0x196   : > { %547 = vst [vmem:[%s1176_s11 + $0x60] sm:$0xff] %v523_v40 }
 0x198   : > { %v490_v41 = vpop.f32.mrf.mxu0  ;;  %v502_v42 = vpop.f32.mrf.mxu1 }
 0x199   : > { %536 = vst [vmem:[%s1176_s11 + $0x8] sm:$0xff] %v490_v41 }
 0x19a   : > { %540 = vst [vmem:[%s1176_s11 + $0x28] sm:$0xff] %v502_v42 }
 0x19c   : > { %v514_v43 = vpop.f32.mrf.mxu2  ;;  %v526_v44 = vpop.f32.mrf.mxu3 }
 0x19d   : > { %544 = vst [vmem:[%s1176_s11 + $0x48] sm:$0xff] %v514_v43 }
 0x19e   : > { %548 = vst [vmem:[%s1176_s11 + $0x68] sm:$0xff] %v526_v44 }
 0x1a0   : > { %v493_v45 = vpop.f32.mrf.mxu0  ;;  %v505_v46 = vpop.f32.mrf.mxu1 }
 0x1a1   : > { %537 = vst [vmem:[%s1176_s11 + $0x10] sm:$0xff] %v493_v45 }
 0x1a2   : > { %541 = vst [vmem:[%s1176_s11 + $0x30] sm:$0xff] %v505_v46 }
 0x1a4   : > { %v517_v47 = vpop.f32.mrf.mxu2  ;;  %v529_v48 = vpop.f32.mrf.mxu3 }
 0x1a5   : > { %545 = vst [vmem:[%s1176_s11 + $0x50] sm:$0xff] %v517_v47 }
 0x1a6   : > { %549 = vst [vmem:[%s1176_s11 + $0x70] sm:$0xff] %v529_v48 }
 0x1a8   : > { %v496_v49 = vpop.f32.mrf.mxu0  ;;  %v508_v50 = vpop.f32.mrf.mxu1 }
 0x1a9   : > { %538 = vst [vmem:[%s1176_s11 + $0x18] sm:$0xff] %v496_v49 }
 0x1aa   : > { %542 = vst [vmem:[%s1176_s11 + $0x38] sm:$0xff] %v508_v50 }
 0x1ac   : > { %v520_v51 = vpop.f32.mrf.mxu2  ;;  %v532_v52 = vpop.f32.mrf.mxu3 }
 0x1ad   : > { %546 = vst [vmem:[%s1176_s11 + $0x58] sm:$0xff] %v520_v51 }
 0x1ae   : > { %550 = vst [vmem:[%s1176_s11 + $0x78] sm:$0xff] %v532_v52 }
 0x1af PF: > { %s702_s28 = sshll.u32 %s1011_s19, 7  ;;  %s564_s26 = sshll.u32 %s1176_s11, 4  ;;  %s565_s26 = int_to_ptr.vmem [resolvable:$true] %s564_s26 }
 0x1b0   : > { %s563_s25 = scalar_lea.hbm %s1345_s3, %s702_s28  ;;  %s552_s8 = scalar_lea.sflag [#allocation5], %s220_s14 }
 0x1b1   : > { %s566_s29 = sshll.u32 %s563_s25, 4  ;;  %s921_s19 = scalar_lea.hbm %s1345_s3, 256  ;;  %s567_s29 = int_to_ptr.hbm [resolvable:$true] %s566_s29 }
 0x1b2   : > { %s915_s9 = sshra.s32 %s567_s29, 4  ;;  %s916_s9 = int_to_ptr.hbm [resolvable:$true] %s915_s9 }
 0x1b3   : > { %s917_s4 = scalar_lea.hbm %s916_s9, 128  ;;  %p922_p0 = scmp.lt.s32.totalorder %s916_s9, %s1345_s3 }
 0x1b4   : > { %p918_p10 = scmp.ne.s32.totalorder %s916_s9, %s917_s4  ;;  %p923_p1 = scmp.lt.s32.totalorder %s921_s19, %s917_s4 }
 0x1b6   : > { %p919_p11 = pnand %p918_p10, %p1133_p12  ;;  %p924_p4 = por %p923_p1, %p922_p0 }
 0x1b8   : > { %p920_p13 = pneg %p919_p11 }
 0x1ba   : > { %p925_p5 = pnand %p924_p4, %p920_p13 }
 0x1bc   : > { %928 = shalt.err (!%p925_p5)
}
 0x1bd   : > { %s1029_s14 = smov 128   ;;  %s1030_s11 = smov 8  }
 0x1be   : > { %765 = dma.vmem_to_hbm [thread:$0]  (%p1133_p12), %s565_s26, 2048, %s567_s29, %s552_s8, %s1029_s14, %s1029_s14, %s1030_s11  }
 0x1bf PF: > { %p776_p6 = scmp.ge.s32.totalorder %s1023_s22, 2  ;;  %s581_s15 = sand.u32 1, %s983_s12  }
 0x1c0   : > { %s582_s18 = scalar_lea.sflag [#allocation5], %s581_s15 }
 0x1c1   : > { %p772_p8 = pnand %p776_p6, %p1146_p2 }
 0x1c3   : > { %p773_p3 = pneg %p772_p8 }
 0x1c5   : > { %978 = dma.done.wait (%p773_p3), %s582_s18, 2048  }
 0x1c6   : > { %980 = vsyncadd (%p773_p3), %s582_s18, 4294965248  ;;  %s19_s22 = sadd.s32 1, %s1023_s22   ;;  %s1360_s23 = sld [smem:[#allocation9_spill]] }
 0x1c7   : > { %p16_p9 = scmp.ge.s32.totalorder %s19_s22, 6   ;;  %s1361_s14 = sld [smem:[#allocation13_spill]] }
 0x1c8   : > { %s1362_s7 = sld [smem:[#allocation10_spill]]  ;;  %s1366_s12 = smov %s987_s13 }
 0x1c9   : > { %s1363_s17 = sld [smem:[#allocation14_spill]]  ;;  %s1368_s15 = smov %s999_s16 }
 0x1ca   : > { %s1364_s28 = sld [smem:[#allocation11_spill]]  ;;  %s1370_s18 = smov %s1015_s20 }
 0x1cb   : > { %s1365_s5 = sld [smem:[#allocation12_spill]]  ;;  %s1371_s19 = smov %s1019_s21 }
 0x1cc   : > { %s1367_s13 = smov %s1360_s23 }
 0x1cd   :  { %18 = sbr.rel (!%p16_p9) target bundleno = 9 (0x9), region = 88 }
 0x1ce   : > { %s1369_s16 = smov %s1362_s7 }
 0x1d0   : > { %s1372_s20 = smov %s1364_s28 }
 0x1d1   : > { %s1373_s21 = smov %s1365_s5 }
 0x1d2   :  { %588 = vsyncpa [#allocation4], 1 }
 0x1d3   :  { %590 = vsyncpa [#allocation4 + $0x1], 1 }
 0x1d4   :  { %591 = vsyncpa [#allocation5], 1 }
 0x1d5   :  { %593 = vsyncpa [#allocation5 + $0x1], 1 }

</bundles_post_ra>
